<compile_context>
chip_gen: v7x
topology: tpu7x:2x2x1
jax: 0.10.0
libtpu: 0.0.40
codegen_flags: <defaults>
</compile_context>

<pallas_src>
import jax
import jax.numpy as jnp
from jax.experimental import pallas as pl
from jax.experimental.pallas import tpu as pltpu


_Y_W = 8  # lane width of the narrow y output (lane 0 carries the prediction)


# ----------------------------------------------------------------------------
# Kernel
# ----------------------------------------------------------------------------
def cfr_net_kernel(
    x_ref,
    # representation layers
    wr1, br1, wr2, br2, wr3, br3,
    # fused regression layers (treatment||control)
    w1f, b1f, w2f, b2f, w3f, b3f, wof, bof,
    # outputs
    h_rep_ref, y_ref,
):
    mm_dtype = wr1.dtype  # matmul input dtype (bf16 or f32); weights pre-cast.

    def lin(a, w_ref, b_ref):
        # MXU matmul with f32 accumulation; bias add in f32.
        return jnp.dot(a.astype(mm_dtype), w_ref[...],
                       preferred_element_type=jnp.float32) + b_ref[...]

    def elu(v):
        # F.elu(alpha=1.0), f32 on the VPU; clamp so the untaken branch is safe.
        return jnp.where(v > 0, v, jnp.exp(jnp.minimum(v, 0.0)) - 1.0)

    x = x_ref[...]                              # already in mm_dtype (no cast)
    # treatment indicator lives in the last zero-padded input lane (exact 0/1)
    tcol = x[:, -1:].astype(jnp.float32)

    # --- representation network (3 x Linear + ELU) ---
    h = elu(lin(x, wr1, br1))
    h = elu(lin(h, wr2, br2))
    h = elu(lin(h, wr3, br3))

    # --- row-normalize: h * rsqrt(max(sum(h^2), eps))  (rsqrt -> EUP slot) ---
    sq = jnp.sum(h * h, axis=1, keepdims=True)
    h = h * jax.lax.rsqrt(jnp.maximum(sq, 1e-10))
    h_rep_ref[...] = h.astype(h_rep_ref.dtype)

    # --- fused treatment||control regression branches (block-diagonal) ---
    g = elu(lin(h, w1f, b1f))
    g = elu(lin(g, w2f, b2f))
    g = elu(lin(g, w3f, b3f))

    # Narrow output head: lane 0 = y_t, lane 1 = y_c; select in-kernel by t.
    yb = lin(g, wof, bof)                        # (tile, _Y_W)
    y_sel = jnp.where(tcol > 0, yb[:, 0:1], yb[:, 1:2])
    y_ref[...] = jnp.broadcast_to(y_sel, y_ref.shape).astype(y_ref.dtype)


# ----------------------------------------------------------------------------
# Parameter packing (done once, outside the kernel)
# ----------------------------------------------------------------------------
def _round_up(a, b):
    return (a + b - 1) // b * b


def _block_diag(a, b):
    ha, wa = a.shape
    hb, wb = b.shape
    top = jnp.concatenate([a, jnp.zeros((ha, wb), a.dtype)], axis=1)
    bot = jnp.concatenate([jnp.zeros((hb, wa), b.dtype), b], axis=1)
    return jnp.concatenate([top, bot], axis=0)


def pack_params(params, matmul_dtype):
    """Pad D_in (+1 lane reserved for t), fuse branches, pre-cast weights."""
    (wr1, br1, wr2, br2, wr3, br3,
     wt1, bt1, wt2, bt2, wt3, bt3, wot, bot,
     wc1, bc1, wc2, bc2, wc3, bc3, woc, boc) = params

    f32 = jnp.float32
    D_in, H_rep = wr1.shape
    H_reg = wt1.shape[1]
    D_pad = _round_up(D_in + 1, 8)   # +1 reserves the last lane for t (zero row)

    # zero-pad the contraction dim of the first layer (25 -> 32)
    wr1p = jnp.zeros((D_pad, H_rep), f32).at[:D_in, :].set(wr1)

    # layer 1: concat -> [H_rep, 2*H_reg]
    w1f = jnp.concatenate([wt1, wc1], axis=1)
    b1f = jnp.concatenate([bt1, bc1], axis=1)
    # layers 2/3: block-diagonal -> [2*H_reg, 2*H_reg]
    w2f = _block_diag(wt2, wc2)
    b2f = jnp.concatenate([bt2, bc2], axis=1)
    w3f = _block_diag(wt3, wc3)
    b3f = jnp.concatenate([bt3, bc3], axis=1)
    # narrow output head: col 0 = treated, col 1 = control, rest zeros
    wof = jnp.zeros((2 * H_reg, _Y_W), f32)
    wof = wof.at[:H_reg, 0:1].set(wot).at[H_reg:, 1:2].set(woc)
    bof = jnp.zeros((1, _Y_W), f32)
    bof = bof.at[:, 0:1].set(bot).at[:, 1:2].set(boc)

    weights = [wr1p, wr2, wr3, w1f, w2f, w3f, wof]
    biases = [br1, br2, br3, b1f, b2f, b3f, bof]
    weights = [w.astype(matmul_dtype) for w in weights]  # bf16 at the MXU
    biases = [b.astype(f32) for b in biases]             # bias add stays f32

    packed = []
    for w, b in zip(weights, biases):
        packed.extend([w, b])
    return tuple(packed), D_pad, H_rep, 2 * H_reg


# ----------------------------------------------------------------------------
# Wrapper
# ----------------------------------------------------------------------------
def cfr_net_forward(x, t, params, *, tile_n=4096, matmul_dtype=jnp.bfloat16,
                    vmem_limit_bytes=32 * 1024 * 1024):
    """CFR-net forward.  x:[N,D_in] f32, t:[N,1] f32 (0/1).

    Returns (y_pred [N,1], h_output_rep [N,H_rep])."""
    N, D_in = x.shape
    packed, D_pad, H_rep, H_reg2 = pack_params(params, matmul_dtype)

    # --- row tile: large (amortize ~0.35 us/grid-step), dtype-aligned sublanes,
    # and keep >= 2 grid steps when the batch allows (both TCs on v7x).
    row_q = 8 if jnp.dtype(matmul_dtype).itemsize >= 4 else 16
    tile = _round_up(min(tile_n, _round_up(N, row_q)), row_q)
    if _round_up(N, row_q) >= 2 * row_q and _round_up(N, tile) // tile < 2:
        tile = _round_up(-(-N // 2), row_q)
    n_pad = _round_up(N, tile)
    grid = (n_pad // tile,)

    # pre-cast input to the matmul dtype; pack t into the last padded lane
    # (its first-layer weight row is zero, so the matmul result is unchanged)
    x_p = jnp.zeros((n_pad, D_pad), matmul_dtype)
    x_p = x_p.at[:N, :D_in].set(x.astype(matmul_dtype))
    x_p = x_p.at[:N, D_pad - 1].set(t.reshape(-1).astype(matmul_dtype))

    def row_spec(width):
        return pl.BlockSpec((tile, width), lambda i: (i, 0))

    def const_spec(arr):  # weights/biases: VMEM-resident across grid steps
        return pl.BlockSpec(arr.shape, lambda i: (0, 0))

    in_specs = [row_spec(D_pad)] + [const_spec(a) for a in packed]
    out_specs = (row_spec(H_rep), row_spec(_Y_W))
    out_shape = (jax.ShapeDtypeStruct((n_pad, H_rep), jnp.float32),
                 jax.ShapeDtypeStruct((n_pad, _Y_W), jnp.float32))

    # advisory cost estimate for XLA's scheduler
    mm_dims = [(D_pad, H_rep), (H_rep, H_rep), (H_rep, H_rep),
               (H_rep, H_reg2), (H_reg2, H_reg2), (H_reg2, H_reg2),
               (H_reg2, _Y_W)]
    flops = 2 * n_pad * sum(k * m for k, m in mm_dims)
    transcendentals = n_pad * (3 * H_rep + 3 * H_reg2 + 1)
    bytes_accessed = (x_p.size * x_p.dtype.itemsize
                      + sum(a.size * a.dtype.itemsize for a in packed)
                      + n_pad * (H_rep + _Y_W) * 4)

    h_rep, y_out = pl.pallas_call(
        cfr_net_kernel,
        grid=grid,
        in_specs=in_specs,
        out_specs=out_specs,
        out_shape=out_shape,
        compiler_params=pltpu.CompilerParams(
            dimension_semantics=("parallel",),   # shard rows across TCs (v7x)
            vmem_limit_bytes=vmem_limit_bytes,   # safe on 64 MiB v7x VMEM
        ),
        cost_estimate=pl.CostEstimate(
            flops=flops,
            transcendentals=transcendentals,
            bytes_accessed=bytes_accessed,
        ),
    )(x_p, *packed)

    return y_out[:N, 0:1], h_rep[:N]


# ----------------------------------------------------------------------------
# Init + pure-JAX reference (PyTorch semantics)
# ----------------------------------------------------------------------------
def init_params(key, D_in, H_rep, H_reg):
    """Mimics nn.Linear default init; weights stored as [fan_in, fan_out]."""
    def linear(k, fan_in, fan_out):
        k1, k2 = jax.random.split(k)
        bound = 1.0 / float(fan_in) ** 0.5
        w = jax.random.uniform(k1, (fan_in, fan_out), jnp.float32, -bound, bound)
        b = jax.random.uniform(k2, (1, fan_out), jnp.float32, -bound, bound)
        return w, b

    keys = jax.random.split(key, 11)
    wr1, br1 = linear(keys[0], D_in, H_rep)
    wr2, br2 = linear(keys[1], H_rep, H_rep)
    wr3, br3 = linear(keys[2], H_rep, H_rep)
    wt1, bt1 = linear(keys[3], H_rep, H_reg)
    wt2, bt2 = linear(keys[4], H_reg, H_reg)
    wt3, bt3 = linear(keys[5], H_reg, H_reg)
    wot, bot = linear(keys[6], H_reg, 1)
    wc1, bc1 = linear(keys[7], H_rep, H_reg)
    wc2, bc2 = linear(keys[8], H_reg, H_reg)
    wc3, bc3 = linear(keys[9], H_reg, H_reg)
    woc, boc = linear(keys[10], H_reg, 1)
    return (wr1, br1, wr2, br2, wr3, br3,
            wt1, bt1, wt2, bt2, wt3, bt3, wot, bot,
            wc1, bc1, wc2, bc2, wc3, bc3, woc, boc)


def reference_forward(x, t, params):
    (wr1, br1, wr2, br2, wr3, br3,
     wt1, bt1, wt2, bt2, wt3, bt3, wot, bot,
     wc1, bc1, wc2, bc2, wc3, bc3, woc, boc) = params

    def elu(v):
        return jnp.where(v > 0, v, jnp.exp(jnp.minimum(v, 0.0)) - 1.0)

    h = elu(x @ wr1 + br1)
    h = elu(h @ wr2 + br2)
    h = elu(h @ wr3 + br3)
    h = h / jnp.sqrt(jnp.maximum(jnp.sum(h * h, axis=1, keepdims=True), 1e-10))

    ht = elu(h @ wt1 + bt1)
    ht = elu(ht @ wt2 + bt2)
    ht = elu(ht @ wt3 + bt3)
    y_t = ht @ wot + bot

    hc = elu(h @ wc1 + bc1)
    hc = elu(hc @ wc2 + bc2)
    hc = elu(hc @ wc3 + bc3)
    y_c = hc @ woc + boc

    return jnp.where(t > 0, y_t, y_c), h


# ----------------------------------------------------------------------------
# Demo / self-check
# ----------------------------------------------------------------------------
if __name__ == "__main__":
    # Small, deterministic problem consistent with the module
    # (patients x 25 features, hidden sizes 32/32).
    N, D_in, H_rep, H_reg = 8, 25, 32, 32

    key = jax.random.PRNGKey(0)
    k_x, k_t, k_p = jax.random.split(key, 3)
    x = jax.random.normal(k_x, (N, D_in), jnp.float32)
    t = jax.random.bernoulli(k_t, 0.5, (N, 1)).astype(jnp.float32)
    params = init_params(k_p, D_in, H_rep, H_reg)

    y_ref, h_ref = reference_forward(x, t, params)

    # 1) f32-MXU path: tight check of the fused / padded / in-kernel-select path.
    y32, h32 = jax.block_until_ready(
        cfr_net_forward(x, t, params, matmul_dtype=jnp.float32))
    assert y32.shape == (N, 1) and h32.shape == (N, H_rep)
    assert jnp.allclose(y32, y_ref, atol=1e-4, rtol=1e-4)
    assert jnp.allclose(h32, h_ref, atol=1e-4, rtol=1e-4)

    # 2) multi-tile path (grid >= 2, padded rows trimmed), still f32 / tight.
    N2 = 40
    k2x, k2t = jax.random.split(jax.random.PRNGKey(1))
    x2 = jax.random.normal(k2x, (N2, D_in), jnp.float32)
    t2 = jax.random.bernoulli(k2t, 0.5, (N2, 1)).astype(jnp.float32)
    y2_ref, h2_ref = reference_forward(x2, t2, params)
    y2, h2 = jax.block_until_ready(
        cfr_net_forward(x2, t2, params, tile_n=16, matmul_dtype=jnp.float32))
    assert y2.shape == (N2, 1) and h2.shape == (N2, H_rep)
    assert jnp.allclose(y2, y2_ref, atol=1e-4, rtol=1e-4)
    assert jnp.allclose(h2, h2_ref, atol=1e-4, rtol=1e-4)

    # 3) default bf16-at-the-MXU path (fast on v5e/v6e/v7x): loose tolerance.
    ybf, hbf = jax.block_until_ready(cfr_net_forward(x, t, params))
    assert ybf.shape == (N, 1) and hbf.shape == (N, H_rep)
    assert jnp.allclose(ybf, y_ref, atol=5e-2, rtol=5e-2)
    assert jnp.allclose(hbf, h_ref, atol=5e-2, rtol=5e-2)

    print("KERNEL_OK")
</pallas_src>

<mosaic_0001>
module attributes {stable_mosaic.version = 11 : i64} {
  func.func @cfr_net_kernel(%arg0: i32, %arg1: memref<8x32xf32, #tpu.memory_space<vmem>>, %arg2: memref<32x32xf32, #tpu.memory_space<vmem>>, %arg3: memref<1x32xf32, #tpu.memory_space<vmem>>, %arg4: memref<32x32xf32, #tpu.memory_space<vmem>>, %arg5: memref<1x32xf32, #tpu.memory_space<vmem>>, %arg6: memref<32x32xf32, #tpu.memory_space<vmem>>, %arg7: memref<1x32xf32, #tpu.memory_space<vmem>>, %arg8: memref<32x64xf32, #tpu.memory_space<vmem>>, %arg9: memref<1x64xf32, #tpu.memory_space<vmem>>, %arg10: memref<64x64xf32, #tpu.memory_space<vmem>>, %arg11: memref<1x64xf32, #tpu.memory_space<vmem>>, %arg12: memref<64x64xf32, #tpu.memory_space<vmem>>, %arg13: memref<1x64xf32, #tpu.memory_space<vmem>>, %arg14: memref<64x8xf32, #tpu.memory_space<vmem>>, %arg15: memref<1x8xf32, #tpu.memory_space<vmem>>, %arg16: memref<8x32xf32, #tpu.memory_space<vmem>>, %arg17: memref<8x8xf32, #tpu.memory_space<vmem>>) attributes {dimension_semantics = [#tpu.dimension_semantics<parallel>], iteration_bounds = array<i64: 1>, scalar_prefetch = 0 : i64, scratch_operands = 0 : i64, tpu.core_type = #tpu.core_type<tc>, window_params = [{transform_indices = @transform_0, window_bounds = array<i64: 8, 32>}, {pipeline_mode = #tpu.pipeline_mode<synchronous>, transform_indices = @transform_1, window_bounds = array<i64: 32, 32>}, {pipeline_mode = #tpu.pipeline_mode<synchronous>, transform_indices = @transform_2, window_bounds = array<i64: 1, 32>}, {pipeline_mode = #tpu.pipeline_mode<synchronous>, transform_indices = @transform_3, window_bounds = array<i64: 32, 32>}, {pipeline_mode = #tpu.pipeline_mode<synchronous>, transform_indices = @transform_4, window_bounds = array<i64: 1, 32>}, {pipeline_mode = #tpu.pipeline_mode<synchronous>, transform_indices = @transform_5, window_bounds = array<i64: 32, 32>}, {pipeline_mode = #tpu.pipeline_mode<synchronous>, transform_indices = @transform_6, window_bounds = array<i64: 1, 32>}, {pipeline_mode = #tpu.pipeline_mode<synchronous>, transform_indices = @transform_7, window_bounds = array<i64: 32, 64>}, {pipeline_mode = #tpu.pipeline_mode<synchronous>, transform_indices = @transform_8, window_bounds = array<i64: 1, 64>}, {pipeline_mode = #tpu.pipeline_mode<synchronous>, transform_indices = @transform_9, window_bounds = array<i64: 64, 64>}, {pipeline_mode = #tpu.pipeline_mode<synchronous>, transform_indices = @transform_10, window_bounds = array<i64: 1, 64>}, {pipeline_mode = #tpu.pipeline_mode<synchronous>, transform_indices = @transform_11, window_bounds = array<i64: 64, 64>}, {pipeline_mode = #tpu.pipeline_mode<synchronous>, transform_indices = @transform_12, window_bounds = array<i64: 1, 64>}, {pipeline_mode = #tpu.pipeline_mode<synchronous>, transform_indices = @transform_13, window_bounds = array<i64: 64, 8>}, {pipeline_mode = #tpu.pipeline_mode<synchronous>, transform_indices = @transform_14, window_bounds = array<i64: 1, 8>}, {transform_indices = @transform_15, window_bounds = array<i64: 8, 32>}, {transform_indices = @transform_16, window_bounds = array<i64: 8, 8>}]} {
    %c0 = arith.constant 0 : index
    %c0_0 = arith.constant 0 : index
    %0 = vector.load %arg1[%c0, %c0_0] : memref<8x32xf32, #tpu.memory_space<vmem>>, vector<8x32xf32>
    %1 = vector.extract_strided_slice %0 {offsets = [0, 31], sizes = [8, 1], strides = [1, 1]} : vector<8x32xf32> to vector<8x1xf32>
    %c0_1 = arith.constant 0 : index
    %c0_2 = arith.constant 0 : index
    %2 = vector.load %arg2[%c0_1, %c0_2] : memref<32x32xf32, #tpu.memory_space<vmem>>, vector<32x32xf32>
    %cst = arith.constant dense<0.000000e+00> : vector<8x32xf32>
    %3 = tpu.matmul %0, %2, %cst {dimension_numbers = #tpu.dot_dimension_numbers<[1], [0], [0], [1], [0, 0, 1, 1], [], []>} : vector<8x32xf32>, vector<32x32xf32>, vector<8x32xf32> -> vector<8x32xf32>
    %c0_3 = arith.constant 0 : index
    %c0_4 = arith.constant 0 : index
    %4 = vector.load %arg3[%c0_3, %c0_4] : memref<1x32xf32, #tpu.memory_space<vmem>>, vector<1x32xf32>
    %5 = vector.broadcast %4 : vector<1x32xf32> to vector<8x32xf32>
    %6 = arith.addf %3, %5 : vector<8x32xf32>
    %cst_5 = arith.constant 0.000000e+00 : f32
    %7 = vector.broadcast %cst_5 : f32 to vector<8x32xf32>
    %8 = arith.cmpf ogt, %6, %7 : vector<8x32xf32>
    %cst_6 = arith.constant 0.000000e+00 : f32
    %9 = vector.broadcast %cst_6 : f32 to vector<8x32xf32>
    %10 = arith.minimumf %6, %9 : vector<8x32xf32>
    %11 = math.exp %10 : vector<8x32xf32>
    %cst_7 = arith.constant 1.000000e+00 : f32
    %12 = vector.broadcast %cst_7 : f32 to vector<8x32xf32>
    %13 = arith.subf %11, %12 : vector<8x32xf32>
    %14 = arith.select %8, %6, %13 : vector<8x32xi1>, vector<8x32xf32>
    %c0_8 = arith.constant 0 : index
    %c0_9 = arith.constant 0 : index
    %15 = vector.load %arg4[%c0_8, %c0_9] : memref<32x32xf32, #tpu.memory_space<vmem>>, vector<32x32xf32>
    %cst_10 = arith.constant dense<0.000000e+00> : vector<8x32xf32>
    %16 = tpu.matmul %14, %15, %cst_10 {dimension_numbers = #tpu.dot_dimension_numbers<[1], [0], [0], [1], [0, 0, 1, 1], [], []>} : vector<8x32xf32>, vector<32x32xf32>, vector<8x32xf32> -> vector<8x32xf32>
    %c0_11 = arith.constant 0 : index
    %c0_12 = arith.constant 0 : index
    %17 = vector.load %arg5[%c0_11, %c0_12] : memref<1x32xf32, #tpu.memory_space<vmem>>, vector<1x32xf32>
    %18 = vector.broadcast %17 : vector<1x32xf32> to vector<8x32xf32>
    %19 = arith.addf %16, %18 : vector<8x32xf32>
    %cst_13 = arith.constant 0.000000e+00 : f32
    %20 = vector.broadcast %cst_13 : f32 to vector<8x32xf32>
    %21 = arith.cmpf ogt, %19, %20 : vector<8x32xf32>
    %cst_14 = arith.constant 0.000000e+00 : f32
    %22 = vector.broadcast %cst_14 : f32 to vector<8x32xf32>
    %23 = arith.minimumf %19, %22 : vector<8x32xf32>
    %24 = math.exp %23 : vector<8x32xf32>
    %cst_15 = arith.constant 1.000000e+00 : f32
    %25 = vector.broadcast %cst_15 : f32 to vector<8x32xf32>
    %26 = arith.subf %24, %25 : vector<8x32xf32>
    %27 = arith.select %21, %19, %26 : vector<8x32xi1>, vector<8x32xf32>
    %c0_16 = arith.constant 0 : index
    %c0_17 = arith.constant 0 : index
    %28 = vector.load %arg6[%c0_16, %c0_17] : memref<32x32xf32, #tpu.memory_space<vmem>>, vector<32x32xf32>
    %cst_18 = arith.constant dense<0.000000e+00> : vector<8x32xf32>
    %29 = tpu.matmul %27, %28, %cst_18 {dimension_numbers = #tpu.dot_dimension_numbers<[1], [0], [0], [1], [0, 0, 1, 1], [], []>} : vector<8x32xf32>, vector<32x32xf32>, vector<8x32xf32> -> vector<8x32xf32>
    %c0_19 = arith.constant 0 : index
    %c0_20 = arith.constant 0 : index
    %30 = vector.load %arg7[%c0_19, %c0_20] : memref<1x32xf32, #tpu.memory_space<vmem>>, vector<1x32xf32>
    %31 = vector.broadcast %30 : vector<1x32xf32> to vector<8x32xf32>
    %32 = arith.addf %29, %31 : vector<8x32xf32>
    %cst_21 = arith.constant 0.000000e+00 : f32
    %33 = vector.broadcast %cst_21 : f32 to vector<8x32xf32>
    %34 = arith.cmpf ogt, %32, %33 : vector<8x32xf32>
    %cst_22 = arith.constant 0.000000e+00 : f32
    %35 = vector.broadcast %cst_22 : f32 to vector<8x32xf32>
    %36 = arith.minimumf %32, %35 : vector<8x32xf32>
    %37 = math.exp %36 : vector<8x32xf32>
    %cst_23 = arith.constant 1.000000e+00 : f32
    %38 = vector.broadcast %cst_23 : f32 to vector<8x32xf32>
    %39 = arith.subf %37, %38 : vector<8x32xf32>
    %40 = arith.select %34, %32, %39 : vector<8x32xi1>, vector<8x32xf32>
    %41 = arith.mulf %40, %40 : vector<8x32xf32>
    %cst_24 = arith.constant dense<0.000000e+00> : vector<8xf32>
    %42 = vector.multi_reduction <add>, %41, %cst_24 [1] : vector<8x32xf32> to vector<8xf32>
    %43 = vector.shape_cast %42 : vector<8xf32> to vector<8x1xf32>
    %cst_25 = arith.constant 1.000000e-10 : f32
    %44 = vector.broadcast %cst_25 : f32 to vector<8x1xf32>
    %45 = arith.maximumf %43, %44 : vector<8x1xf32>
    %46 = math.rsqrt %45 : vector<8x1xf32>
    %47 = vector.broadcast %46 : vector<8x1xf32> to vector<8x32xf32>
    %48 = arith.mulf %40, %47 : vector<8x32xf32>
    %c0_26 = arith.constant 0 : index
    %c0_27 = arith.constant 0 : index
    %49 = vector.load %arg16[%c0_26, %c0_27] : memref<8x32xf32, #tpu.memory_space<vmem>>, vector<8x32xf32>
    tpu.vector_store %arg16[%c0_26, %c0_27], %48 {strides = array<i32>} : memref<8x32xf32, #tpu.memory_space<vmem>>, vector<8x32xf32>,
    %c0_28 = arith.constant 0 : index
    %c0_29 = arith.constant 0 : index
    %50 = vector.load %arg8[%c0_28, %c0_29] : memref<32x64xf32, #tpu.memory_space<vmem>>, vector<32x64xf32>
    %cst_30 = arith.constant dense<0.000000e+00> : vector<8x64xf32>
    %51 = tpu.matmul %48, %50, %cst_30 {dimension_numbers = #tpu.dot_dimension_numbers<[1], [0], [0], [1], [0, 0, 1, 1], [], []>} : vector<8x32xf32>, vector<32x64xf32>, vector<8x64xf32> -> vector<8x64xf32>
    %c0_31 = arith.constant 0 : index
    %c0_32 = arith.constant 0 : index
    %52 = vector.load %arg9[%c0_31, %c0_32] : memref<1x64xf32, #tpu.memory_space<vmem>>, vector<1x64xf32>
    %53 = vector.broadcast %52 : vector<1x64xf32> to vector<8x64xf32>
    %54 = arith.addf %51, %53 : vector<8x64xf32>
    %cst_33 = arith.constant 0.000000e+00 : f32
    %55 = vector.broadcast %cst_33 : f32 to vector<8x64xf32>
    %56 = arith.cmpf ogt, %54, %55 : vector<8x64xf32>
    %cst_34 = arith.constant 0.000000e+00 : f32
    %57 = vector.broadcast %cst_34 : f32 to vector<8x64xf32>
    %58 = arith.minimumf %54, %57 : vector<8x64xf32>
    %59 = math.exp %58 : vector<8x64xf32>
    %cst_35 = arith.constant 1.000000e+00 : f32
    %60 = vector.broadcast %cst_35 : f32 to vector<8x64xf32>
    %61 = arith.subf %59, %60 : vector<8x64xf32>
    %62 = arith.select %56, %54, %61 : vector<8x64xi1>, vector<8x64xf32>
    %c0_36 = arith.constant 0 : index
    %c0_37 = arith.constant 0 : index
    %63 = vector.load %arg10[%c0_36, %c0_37] : memref<64x64xf32, #tpu.memory_space<vmem>>, vector<64x64xf32>
    %cst_38 = arith.constant dense<0.000000e+00> : vector<8x64xf32>
    %64 = tpu.matmul %62, %63, %cst_38 {dimension_numbers = #tpu.dot_dimension_numbers<[1], [0], [0], [1], [0, 0, 1, 1], [], []>} : vector<8x64xf32>, vector<64x64xf32>, vector<8x64xf32> -> vector<8x64xf32>
    %c0_39 = arith.constant 0 : index
    %c0_40 = arith.constant 0 : index
    %65 = vector.load %arg11[%c0_39, %c0_40] : memref<1x64xf32, #tpu.memory_space<vmem>>, vector<1x64xf32>
    %66 = vector.broadcast %65 : vector<1x64xf32> to vector<8x64xf32>
    %67 = arith.addf %64, %66 : vector<8x64xf32>
    %cst_41 = arith.constant 0.000000e+00 : f32
    %68 = vector.broadcast %cst_41 : f32 to vector<8x64xf32>
    %69 = arith.cmpf ogt, %67, %68 : vector<8x64xf32>
    %cst_42 = arith.constant 0.000000e+00 : f32
    %70 = vector.broadcast %cst_42 : f32 to vector<8x64xf32>
    %71 = arith.minimumf %67, %70 : vector<8x64xf32>
    %72 = math.exp %71 : vector<8x64xf32>
    %cst_43 = arith.constant 1.000000e+00 : f32
    %73 = vector.broadcast %cst_43 : f32 to vector<8x64xf32>
    %74 = arith.subf %72, %73 : vector<8x64xf32>
    %75 = arith.select %69, %67, %74 : vector<8x64xi1>, vector<8x64xf32>
    %c0_44 = arith.constant 0 : index
    %c0_45 = arith.constant 0 : index
    %76 = vector.load %arg12[%c0_44, %c0_45] : memref<64x64xf32, #tpu.memory_space<vmem>>, vector<64x64xf32>
    %cst_46 = arith.constant dense<0.000000e+00> : vector<8x64xf32>
    %77 = tpu.matmul %75, %76, %cst_46 {dimension_numbers = #tpu.dot_dimension_numbers<[1], [0], [0], [1], [0, 0, 1, 1], [], []>} : vector<8x64xf32>, vector<64x64xf32>, vector<8x64xf32> -> vector<8x64xf32>
    %c0_47 = arith.constant 0 : index
    %c0_48 = arith.constant 0 : index
    %78 = vector.load %arg13[%c0_47, %c0_48] : memref<1x64xf32, #tpu.memory_space<vmem>>, vector<1x64xf32>
    %79 = vector.broadcast %78 : vector<1x64xf32> to vector<8x64xf32>
    %80 = arith.addf %77, %79 : vector<8x64xf32>
    %cst_49 = arith.constant 0.000000e+00 : f32
    %81 = vector.broadcast %cst_49 : f32 to vector<8x64xf32>
    %82 = arith.cmpf ogt, %80, %81 : vector<8x64xf32>
    %cst_50 = arith.constant 0.000000e+00 : f32
    %83 = vector.broadcast %cst_50 : f32 to vector<8x64xf32>
    %84 = arith.minimumf %80, %83 : vector<8x64xf32>
    %85 = math.exp %84 : vector<8x64xf32>
    %cst_51 = arith.constant 1.000000e+00 : f32
    %86 = vector.broadcast %cst_51 : f32 to vector<8x64xf32>
    %87 = arith.subf %85, %86 : vector<8x64xf32>
    %88 = arith.select %82, %80, %87 : vector<8x64xi1>, vector<8x64xf32>
    %c0_52 = arith.constant 0 : index
    %c0_53 = arith.constant 0 : index
    %89 = vector.load %arg14[%c0_52, %c0_53] : memref<64x8xf32, #tpu.memory_space<vmem>>, vector<64x8xf32>
    %cst_54 = arith.constant dense<0.000000e+00> : vector<8x8xf32>
    %90 = tpu.matmul %88, %89, %cst_54 {dimension_numbers = #tpu.dot_dimension_numbers<[1], [0], [0], [1], [0, 0, 1, 1], [], []>} : vector<8x64xf32>, vector<64x8xf32>, vector<8x8xf32> -> vector<8x8xf32>
    %c0_55 = arith.constant 0 : index
    %c0_56 = arith.constant 0 : index
    %91 = vector.load %arg15[%c0_55, %c0_56] : memref<1x8xf32, #tpu.memory_space<vmem>>, vector<1x8xf32>
    %92 = vector.broadcast %91 : vector<1x8xf32> to vector<8x8xf32>
    %93 = arith.addf %90, %92 : vector<8x8xf32>
    %cst_57 = arith.constant 0.000000e+00 : f32
    %94 = vector.broadcast %cst_57 : f32 to vector<8x1xf32>
    %95 = arith.cmpf ogt, %1, %94 : vector<8x1xf32>
    %96 = vector.extract_strided_slice %93 {offsets = [0, 0], sizes = [8, 1], strides = [1, 1]} : vector<8x8xf32> to vector<8x1xf32>
    %97 = vector.extract_strided_slice %93 {offsets = [0, 1], sizes = [8, 1], strides = [1, 1]} : vector<8x8xf32> to vector<8x1xf32>
    %98 = arith.select %95, %96, %97 : vector<8x1xi1>, vector<8x1xf32>
    %99 = vector.shape_cast %98 : vector<8x1xf32> to vector<8x1xf32>
    %100 = vector.broadcast %99 : vector<8x1xf32> to vector<8x8xf32>
    %c0_58 = arith.constant 0 : index
    %c0_59 = arith.constant 0 : index
    %101 = vector.load %arg17[%c0_58, %c0_59] : memref<8x8xf32, #tpu.memory_space<vmem>>, vector<8x8xf32>
    tpu.vector_store %arg17[%c0_58, %c0_59], %100 {strides = array<i32>} : memref<8x8xf32, #tpu.memory_space<vmem>>, vector<8x8xf32>,
    return
  }
  func.func @transform_0(%arg0: i32) -> (i32, i32) {
    %c0_i32 = arith.constant 0 : i32
    %c0_i32_0 = arith.constant 0 : i32
    return %arg0, %c0_i32 : i32, i32
  }
  func.func @transform_1(%arg0: i32) -> (i32, i32) {
    %c0_i32 = arith.constant 0 : i32
    %c0_i32_0 = arith.constant 0 : i32
    %c0_i32_1 = arith.constant 0 : i32
    return %c0_i32, %c0_i32_0 : i32, i32
  }
  func.func @transform_2(%arg0: i32) -> (i32, i32) {
    %c0_i32 = arith.constant 0 : i32
    %c0_i32_0 = arith.constant 0 : i32
    %c0_i32_1 = arith.constant 0 : i32
    return %c0_i32, %c0_i32_0 : i32, i32
  }
  func.func @transform_3(%arg0: i32) -> (i32, i32) {
    %c0_i32 = arith.constant 0 : i32
    %c0_i32_0 = arith.constant 0 : i32
    %c0_i32_1 = arith.constant 0 : i32
    return %c0_i32, %c0_i32_0 : i32, i32
  }
  func.func @transform_4(%arg0: i32) -> (i32, i32) {
    %c0_i32 = arith.constant 0 : i32
    %c0_i32_0 = arith.constant 0 : i32
    %c0_i32_1 = arith.constant 0 : i32
    return %c0_i32, %c0_i32_0 : i32, i32
  }
  func.func @transform_5(%arg0: i32) -> (i32, i32) {
    %c0_i32 = arith.constant 0 : i32
    %c0_i32_0 = arith.constant 0 : i32
    %c0_i32_1 = arith.constant 0 : i32
    return %c0_i32, %c0_i32_0 : i32, i32
  }
  func.func @transform_6(%arg0: i32) -> (i32, i32) {
    %c0_i32 = arith.constant 0 : i32
    %c0_i32_0 = arith.constant 0 : i32
    %c0_i32_1 = arith.constant 0 : i32
    return %c0_i32, %c0_i32_0 : i32, i32
  }
  func.func @transform_7(%arg0: i32) -> (i32, i32) {
    %c0_i32 = arith.constant 0 : i32
    %c0_i32_0 = arith.constant 0 : i32
    %c0_i32_1 = arith.constant 0 : i32
    return %c0_i32, %c0_i32_0 : i32, i32
  }
  func.func @transform_8(%arg0: i32) -> (i32, i32) {
    %c0_i32 = arith.constant 0 : i32
    %c0_i32_0 = arith.constant 0 : i32
    %c0_i32_1 = arith.constant 0 : i32
    return %c0_i32, %c0_i32_0 : i32, i32
  }
  func.func @transform_9(%arg0: i32) -> (i32, i32) {
    %c0_i32 = arith.constant 0 : i32
    %c0_i32_0 = arith.constant 0 : i32
    %c0_i32_1 = arith.constant 0 : i32
    return %c0_i32, %c0_i32_0 : i32, i32
  }
  func.func @transform_10(%arg0: i32) -> (i32, i32) {
    %c0_i32 = arith.constant 0 : i32
    %c0_i32_0 = arith.constant 0 : i32
    %c0_i32_1 = arith.constant 0 : i32
    return %c0_i32, %c0_i32_0 : i32, i32
  }
  func.func @transform_11(%arg0: i32) -> (i32, i32) {
    %c0_i32 = arith.constant 0 : i32
    %c0_i32_0 = arith.constant 0 : i32
    %c0_i32_1 = arith.constant 0 : i32
    return %c0_i32, %c0_i32_0 : i32, i32
  }
  func.func @transform_12(%arg0: i32) -> (i32, i32) {
    %c0_i32 = arith.constant 0 : i32
    %c0_i32_0 = arith.constant 0 : i32
    %c0_i32_1 = arith.constant 0 : i32
    return %c0_i32, %c0_i32_0 : i32, i32
  }
  func.func @transform_13(%arg0: i32) -> (i32, i32) {
    %c0_i32 = arith.constant 0 : i32
    %c0_i32_0 = arith.constant 0 : i32
    %c0_i32_1 = arith.constant 0 : i32
    return %c0_i32, %c0_i32_0 : i32, i32
  }
  func.func @transform_14(%arg0: i32) -> (i32, i32) {
    %c0_i32 = arith.constant 0 : i32
    %c0_i32_0 = arith.constant 0 : i32
    %c0_i32_1 = arith.constant 0 : i32
    return %c0_i32, %c0_i32_0 : i32, i32
  }
  func.func @transform_15(%arg0: i32) -> (i32, i32) {
    %c0_i32 = arith.constant 0 : i32
    %c0_i32_0 = arith.constant 0 : i32
    return %arg0, %c0_i32 : i32, i32
  }
  func.func @transform_16(%arg0: i32) -> (i32, i32) {
    %c0_i32 = arith.constant 0 : i32
    %c0_i32_0 = arith.constant 0 : i32
    return %arg0, %c0_i32 : i32, i32
  }
}

</mosaic_0001>

<bundles_post_ra>
// kernel: tpu_custom_call.1
= control target key start
LH: loop header
LB: loop body
LE: loop exit
PB: predicated region body
PF: predicated region fallthrough
CT: control target
= control target key end

     0   :  { %s1561_s0 = inlined_call_operand.hbm [shape: f32[8,32], index: 0, kind: input, shape index: {}]   ;;  %s1562_s1 = inlined_call_operand.vmem [shape: f32[32,32], index: 1, kind: input, shape index: {}]   ;;  %s1563_s2 = inlined_call_operand.vmem [shape: f32[1,32], index: 2, kind: input, shape index: {}]   ;;  %s1564_s3 = inlined_call_operand.hbm [shape: f32[32,32], index: 3, kind: input, shape index: {}]   ;;  %s1565_s4 = inlined_call_operand.vmem [shape: f32[1,32], index: 4, kind: input, shape index: {}]   ;;  %s1566_s5 = inlined_call_operand.hbm [shape: f32[32,32], index: 5, kind: input, shape index: {}]   ;;  %s1567_s6 = inlined_call_operand.vmem [shape: f32[1,32], index: 6, kind: input, shape index: {}]   ;;  %s1568_s7 = inlined_call_operand.hbm [shape: f32[32,64], index: 7, kind: input, shape index: {}]   ;;  %s1569_s8 = inlined_call_operand.vmem [shape: f32[1,64], index: 8, kind: input, shape index: {}]   ;;  %s1570_s9 = inlined_call_operand.vmem [shape: f32[64,64], index: 9, kind: input, shape index: {}]   ;;  %s1571_s10 = inlined_call_operand.vmem [shape: f32[1,64], index: 10, kind: input, shape index: {}]   ;;  %s1572_s11 = inlined_call_operand.hbm [shape: f32[64,64], index: 11, kind: input, shape index: {}]   ;;  %s1573_s12 = inlined_call_operand.vmem [shape: f32[1,64], index: 12, kind: input, shape index: {}]   ;;  %s1574_s13 = inlined_call_operand.vmem [shape: f32[64,8], index: 13, kind: input, shape index: {}]   ;;  %s1575_s14 = inlined_call_operand.vmem [shape: f32[1,8], index: 14, kind: input, shape index: {}]   ;;  %s1576_s15 = inlined_call_operand.hbm [shape: f32[8,32], index: 15, kind: output, shape index: {0}]   ;;  %s1577_s16 = inlined_call_operand.hbm [shape: f32[8,8], index: 16, kind: output, shape index: {1}]  }
   0x1   :  { %1580 = sst [smem:[#allocation19_spill]] %s1561_s0 }
   0x2   :  { %1581 = sst [smem:[#allocation20_spill]] %s1577_s16 }
   0x3   :  { %22 = vsyncpa [#allocation3], 0 }
   0x4   :  { %23 = vsyncpa [#allocation6], 0 }
   0x5   :  { %24 = vsyncpa [#allocation9], 0 }
   0x6   :  { %25 = vsyncpa [#allocation4], 0 }
   0x7   :  { %26 = vsyncpa [#allocation13], 0  ;;  %s1237_s21 = smov [#allocation5]   ;;  %s1073_s25 = scalar_lea.hbm %s1564_s3, 512 }
   0x8   :  { %s46_s22 = sshll.u32 %s1237_s21, 4  ;;  %p1074_p0 = scmp.ne.s32.totalorder %s1564_s3, %s1073_s25  ;;  %s47_s22 = int_to_ptr.vmem [resolvable:$true] %s46_s22 }
   0x9   :  { %p1077_p1 = scmp.lt.u32.totalorder %s1073_s25, %s1564_s3 }
   0xb   :  { %p1079_p2 = pnand %p1077_p1, %p1074_p0 }
   0xd   :  { %1082 = shalt.err (!%p1079_p2)
}
   0xe   :  { %s1083_s30 = scalar_lea.vmem %s47_s22, 512  ;;  %p1088_p4 = scmp.lt.s32.totalorder %s47_s22, %s47_s22 }
   0xf   :  { %p1084_p3 = scmp.ne.s32.totalorder %s47_s22, %s1083_s30  ;;  %p1089_p5 = scmp.lt.s32.totalorder %s1083_s30, %s1083_s30 }
  0x11   :  { %p1090_p6 = por %p1089_p5, %p1088_p4 }
  0x13   :  { %p1091_p7 = pnand %p1090_p6, %p1084_p3 }
  0x15   :  { %1094 = shalt.err (!%p1091_p7)
}
  0x16   :  { %s1238_s0 = smov 128   ;;  %s1239_s17 = smov 8  }
  0x17   :  { %52 = dma.hbm_to_vmem [thread:$0]  %s1564_s3, 512, %s47_s22, [#allocation6], %s1238_s0, %s1238_s0, %s1239_s17  }
  0x18   :  { %s1240_s20 = smov [#allocation8]   ;;  %s1241_s23 = smov [#allocation2]  }
  0x19   :  { %s74_s21 = sshll.u32 %s1240_s20, 4  ;;  %s33_s24 = sshll.u32 %s1241_s23, 4  ;;  %s75_s21 = int_to_ptr.vmem [resolvable:$true] %s74_s21  ;;  %s34_s24 = int_to_ptr.vmem [resolvable:$true] %s33_s24 }
  0x1a   :  { %s1095_s27 = scalar_lea.hbm %s1568_s7, 512 }
  0x1b   :  { %p1096_p8 = scmp.ne.s32.totalorder %s1568_s7, %s1095_s27  ;;  %p1099_p9 = scmp.lt.u32.totalorder %s1095_s27, %s1568_s7 }
  0x1d   :  { %p1101_p10 = pnand %p1099_p9, %p1096_p8 }
  0x1f   :  { %1104 = shalt.err (!%p1101_p10)
}
  0x20   :  { %s1105_s3 = scalar_lea.vmem %s75_s21, 512  ;;  %p1110_p12 = scmp.lt.s32.totalorder %s75_s21, %s75_s21 }
  0x21   :  { %p1106_p11 = scmp.ne.s32.totalorder %s75_s21, %s1105_s3  ;;  %p1111_p13 = scmp.lt.s32.totalorder %s1105_s3, %s1105_s3 }
  0x23   :  { %p1112_p0 = por %p1111_p13, %p1110_p12 }
  0x25   :  { %p1113_p1 = pnand %p1112_p0, %p1106_p11 }
  0x27   :  { %1116 = shalt.err (!%p1113_p1)
}
  0x28   :  { %80 = dma.hbm_to_vmem [thread:$0]  %s1568_s7, 512, %s75_s21, [#allocation9], %s1238_s0, %s1238_s0, %s1239_s17  }
  0x29   :  { %s1582_s20 = sld [smem:[#allocation19_spill]] }
  0x2f   :  { %s1117_s23 = scalar_lea.hbm %s1582_s20, 128 }
  0x30   :  { %p1118_p2 = scmp.ne.s32.totalorder %s1582_s20, %s1117_s23  ;;  %p1121_p3 = scmp.lt.u32.totalorder %s1117_s23, %s1582_s20 }
  0x32   :  { %p1123_p4 = pnand %p1121_p3, %p1118_p2 }
  0x34   :  { %1126 = shalt.err (!%p1123_p4)
}
  0x35   :  { %s1127_s29 = scalar_lea.vmem %s34_s24, 128  ;;  %p1132_p6 = scmp.lt.s32.totalorder %s34_s24, %s34_s24 }
  0x36   :  { %p1128_p5 = scmp.ne.s32.totalorder %s34_s24, %s1127_s29  ;;  %p1133_p7 = scmp.lt.s32.totalorder %s1127_s29, %s1127_s29 }
  0x38   :  { %p1134_p8 = por %p1133_p7, %p1132_p6 }
  0x3a   :  { %p1135_p9 = pnand %p1134_p8, %p1128_p5 }
  0x3c   :  { %1138 = shalt.err (!%p1135_p9)
}
  0x3d   :  { %36 = dma.hbm_to_vmem [thread:$0]  %s1582_s20, 128, %s34_s24, [#allocation3]  }
  0x3e   :  { %s1242_s30 = smov [#allocation7]   ;;  %s1243_s22 = smov [#allocation10]  }
  0x3f   :  { %s60_s3 = sshll.u32 %s1242_s30, 4  ;;  %s92_s18 = sshll.u32 %s1243_s22, 4  ;;  %s61_s3 = int_to_ptr.vmem [resolvable:$true] %s60_s3  ;;  %s93_s18 = int_to_ptr.vmem [resolvable:$true] %s92_s18 }
  0x40   :  { %s1139_s23 = scalar_lea.hbm %s1566_s5, 512 }
  0x41   :  { %p1140_p10 = scmp.ne.s32.totalorder %s1566_s5, %s1139_s23  ;;  %p1143_p11 = scmp.lt.u32.totalorder %s1139_s23, %s1566_s5 }
  0x43   :  { %p1145_p12 = pnand %p1143_p11, %p1140_p10 }
  0x45   :  { %1148 = shalt.err (!%p1145_p12)
}
  0x46   :  { %s1149_s24 = scalar_lea.vmem %s61_s3, 512  ;;  %p1154_p0 = scmp.lt.s32.totalorder %s61_s3, %s61_s3 }
  0x47   :  { %p1150_p13 = scmp.ne.s32.totalorder %s61_s3, %s1149_s24  ;;  %p1155_p1 = scmp.lt.s32.totalorder %s1149_s24, %s1149_s24 }
  0x49   :  { %p1156_p2 = por %p1155_p1, %p1154_p0 }
  0x4b   :  { %p1157_p3 = pnand %p1156_p2, %p1150_p13 }
  0x4d   :  { %1160 = shalt.err (!%p1157_p3)
}
  0x4e   :  { %66 = dma.hbm_to_vmem [thread:$0]  %s1566_s5, 512, %s61_s3, [#allocation6], %s1238_s0, %s1238_s0, %s1239_s17  }
  0x4f   :  { %s1161_s30 = scalar_lea.hbm %s1572_s11, 1024 }
  0x50   :  { %p1162_p4 = scmp.ne.s32.totalorder %s1572_s11, %s1161_s30  ;;  %p1165_p5 = scmp.lt.u32.totalorder %s1161_s30, %s1572_s11 }
  0x52   :  { %p1167_p6 = pnand %p1165_p5, %p1162_p4 }
  0x54   :  { %1170 = shalt.err (!%p1167_p6)
}
  0x55   :  { %s1171_s25 = scalar_lea.vmem %s93_s18, 1024  ;;  %p1176_p8 = scmp.lt.s32.totalorder %s93_s18, %s93_s18 }
  0x56   :  { %p1172_p7 = scmp.ne.s32.totalorder %s93_s18, %s1171_s25  ;;  %p1177_p9 = scmp.lt.s32.totalorder %s1171_s25, %s1171_s25 }
  0x58   :  { %p1178_p10 = por %p1177_p9, %p1176_p8 }
  0x5a   :  { %p1179_p11 = pnand %p1178_p10, %p1172_p7 }
  0x5c   :  { %1182 = shalt.err (!%p1179_p11)
}
  0x5d   :  { %98 = dma.hbm_to_vmem [thread:$0]  %s1572_s11, 1024, %s93_s18, [#allocation9], %s1238_s0, %s1238_s0, %s1239_s17  }
  0x5e   :  { %1227 = dma.done.wait [#allocation3], 128  }
  0x5f   :  { %1228 = vsyncadd [#allocation3], 4294967168 }
  0x60   :  { %1229 = dma.done.wait [#allocation6], 1024  }
  0x61   :  { %1230 = vsyncadd [#allocation6], 4294966272 }
  0x62   :  { %1231 = dma.done.wait [#allocation9], 1536  }
  0x63   :  { %1232 = vsyncadd [#allocation9], 4294965760  ;;  %v1244_v0 = vmov 0.0|0.0   ;;  %vm1245_vm0 = vmmov 0   ;;  %v1246_v1 = vmov 0.0   ;;  %v121_v2 = vld [vmem:[%s1562_s1] sm:$0xff] }
  0x64   :  { %982 = vmatprep.subr.bf16.mxu1 %v1244_v0  ;;  %889 = vmatprep.mubr.msk.f32.mxu1 %vm1245_vm0, %v1246_v1  ;;  %v122_v3 = vld [vmem:[%s1562_s1 + $0x8] sm:$0xff]  ;;  %v123_v4 = vld [vmem:[%s1562_s1 + $0x10] sm:$0xff]  ;;  %v124_v6 = vld [vmem:[%s1562_s1 + $0x18] sm:$0xff]  ;;  %vm132_vm1 = vcmask 261120   ;;  %vm505_vm5 = vcmask 523264   ;;  %s1249_s17 = smov 31  }
  0x65   :  { %994 = vmatprep.subr.bf16.mxu0 %v1244_v0  ;;  %911 = vmatprep.mubr.msk.f32.mxu0 %vm1245_vm0, %v1246_v1  ;;  %v983_v5 = vpack.c.bf16 %v122_v3, %v121_v2  ;;  %v986_v7 = vpack.c.bf16 %v124_v6, %v123_v4  ;;  %v1428_v8 = vld [vmem:[#allocation2] sm:$0xff]  ;;  %v212_v9 = vld [vmem:[#allocation5] sm:$0xff]  ;;  %v213_v10 = vld [vmem:[#allocation5 + $0x8] sm:$0xff]  ;;  %s1250_s18 = smov [#allocation11]  }
  0x66   :  { %v989_v11 = vpack.c.bf16 %v213_v10, %v212_v9  ;;  %v214_v12 = vld [vmem:[#allocation5 + $0x10] sm:$0xff]  ;;  %v215_v13 = vld [vmem:[#allocation5 + $0x18] sm:$0xff]  ;;  %v302_v24 = vld [vmem:[#allocation7] sm:$0xff]  ;;  %vm767_vm9 = vcmp.gt.f32.partialorder %v1428_v8, 0.0  ;;  %s789_s26 = sshll.u32 %s1250_s18, 4  ;;  %s790_s26 = int_to_ptr.vmem [resolvable:$true] %s789_s26 }
  0x67   :  { %984 = vmatpush3.bf16.msra.mxu1 %v983_v5  ;;  %v992_v14 = vpack.c.bf16 %v215_v13, %v214_v12  ;;  %v814_v15 = vld [vmem:[%s1563_s2] ss:$0 sm:$0xff]  ;;  %v303_v25 = vld [vmem:[#allocation7 + $0x8] sm:$0xff]  ;;  %v304_v26 = vld [vmem:[#allocation7 + $0x10] sm:$0xff]  ;;  %s1183_s27 = scalar_lea.vmem %s790_s26, 128  ;;  %p1188_p13 = scmp.lt.s32.totalorder %s790_s26, %s790_s26 }
  0x68   :  { %985 = vmatprep.subr.bf16.mxu1 %v1244_v0  ;;  %v995_v27 = vpack.c.bf16 %v303_v25, %v302_v24  ;;  %v305_v28 = vld [vmem:[#allocation7 + $0x18] sm:$0xff]  ;;  %v400_v50 = vld [vmem:[#allocation8] sm:$0xff]  ;;  %v401_v51 = vld [vmem:[#allocation8 + $0x8] sm:$0xff]  ;;  %p1184_p12 = scmp.ne.s32.totalorder %s790_s26, %s1183_s27  ;;  %p1189_p0 = scmp.lt.s32.totalorder %s1183_s27, %s1183_s27 }
  0x69   :  { %v998_v29 = vpack.c.bf16 %v305_v28, %v304_v26  ;;  %v817_v30 = vld [vmem:[%s1565_s4] ss:$0 sm:$0xff]  ;;  %v402_v52 = vld [vmem:[#allocation8 + $0x10] sm:$0xff]  ;;  %v1001_v53 = vpack.c.bf16 %v401_v51, %v400_v50  ;;  %v491_v61 = vld [vmem:[%s1570_s9 + $0x8] sm:$0xff] }
  0x6a   :  { %996 = vmatpush3.bf16.msra.mxu0 %v995_v27  ;;  %v820_v39 = vld [vmem:[%s1567_s6] ss:$0 sm:$0xff]  ;;  %v492_v63 = vld [vmem:[%s1570_s9 + $0x10] sm:$0xff]  ;;  %v493_v2 = vld [vmem:[%s1570_s9 + $0x18] sm:$0xff]  ;;  %p1190_p1 = por %p1189_p0, %p1188_p13 }
  0x6b   :  { %987 = vmatpush3.bf16.msra.mxu1 %v986_v7  ;;  %997 = vmatprep.subr.bf16.mxu0 %v1244_v0  ;;  %v403_v54 = vld [vmem:[#allocation8 + $0x18] sm:$0xff]  ;;  %v1010_v3 = vpack.c.bf16 %v493_v2, %v492_v63  ;;  %v495_v5 = vld [vmem:[%s1570_s9 + $0x28] sm:$0xff]  ;;  %v496_v7 = vld [vmem:[%s1570_s9 + $0x30] sm:$0xff] }
  0x6c   :  { %988 = vmatprep.subr.bf16.mxu1 %v1244_v0  ;;  %v1004_v55 = vpack.c.bf16 %v403_v54, %v402_v52  ;;  %v490_v60 = vld [vmem:[%s1570_s9] sm:$0xff]  ;;  %v497_v9 = vld [vmem:[%s1570_s9 + $0x38] sm:$0xff]  ;;  %v589_v26 = vld [vmem:[#allocation10 + $0x20] sm:$0xff]  ;;  %p1191_p2 = pnand %p1190_p1, %p1184_p12 }
  0x6d   :  { %v1007_v62 = vpack.c.bf16 %v491_v61, %v490_v60  ;;  %v494_v4 = vld [vmem:[%s1570_s9 + $0x20] sm:$0xff]  ;;  %v1016_v10 = vpack.c.bf16 %v497_v9, %v496_v7  ;;  %v590_v27 = vld [vmem:[#allocation10 + $0x28] sm:$0xff]  ;;  %v686_v50 = vld [vmem:[%s1574_s13 + $0x38] sm:$0xff]  ;;  %v1247_v60 = vmov 31  }
  0x6e   :  { %890 = vmatmul.mubr.msk.f32.vlgmr.msra.gmra.mrb[0].mxu1 %vm132_vm1, %v1428_v8  ;;  %999 = vmatpush3.bf16.msra.mxu0 %v998_v29  ;;  %v1013_v6 = vpack.c.bf16 %v495_v5, %v494_v4  ;;  %v588_v24 = vld [vmem:[#allocation10 + $0x18] sm:$0xff]  ;;  %v1025_v28 = vpack.c.bf16 %v590_v27, %v589_v26  ;;  %v591_v29 = vld [vmem:[#allocation10 + $0x30] sm:$0xff] }
  0x6f   :  { %900 = vmatprep.mubr.msk.f32.mxu1 %vm1245_vm0, %v1246_v1  ;;  %990 = vmatpush3.bf16.msra.mxu1 %v989_v11  ;;  %v823_v11 = vld [vmem:[%s1569_s8] ss:$0 sm:$0xff] }
  0x70   :  { %991 = vmatprep.subr.bf16.mxu1 %v1244_v0  ;;  %1006 = vmatprep.subr.bf16.mxu0 %v1244_v0  ;;  %v829_v52 = vld [vmem:[%s1573_s12] ss:$0 sm:$0xff]  ;;  %s1248_s12 = smov 30  }
  0x71   :  { %1057 = vset.pattern.permute.xlu1 %v1247_v60  ;;  %1058 = vset.pattern.permute.xlu0 %v1247_v60  ;;  %v832_v61 = vld [vmem:[%s1575_s14] ss:$0 sm:$0xff] }
  0x73   :  { %993 = vmatpush3.bf16.msra.mxu1 %v992_v14 }
  0x74   :  { %1000 = vmatprep.subr.bf16.mxu1 %v1244_v0 }
 0x141   :  { %v202_v16 = vpop.f32.mrb[0].mxu1 }
 0x142   :  { %v203_v17 = vadd.f32 %v814_v15, %v202_v16  ;;  %v891_v18 = vpop.f32.mrb[1].mxu1 }
 0x144   :  { %v207_v19 = vmin.f32 %v203_v17, 0.0  ;;  %vm206_vm2 = vcmp.gt.f32.partialorder %v203_v17, 0.0 }
 0x146   :  { %v208_v20 = vmul.f32 1.442695, %v207_v19 }
 0x148   :  { %1059 = vpow2.f32 %v208_v20  ;;  %v585_v20 = vld [vmem:[#allocation10] sm:$0xff] }
 0x152   :  { %v1060_v21 = vpop.eup %1059 }
 0x153   :  { %v816_v22 = vadd.f32 -1.0, %v1060_v21  ;;  %v586_v21 = vld [vmem:[#allocation10 + $0x8] sm:$0xff] }
 0x155   :  { %v211_v23 = vsel %vm206_vm2, %v203_v17, %v816_v22  ;;  %v1019_v22 = vpack.c.bf16 %v586_v21, %v585_v20 }
 0x156   :  { %901 = vmatmul.mubr.msk.f32.vlgmr.msra.gmra.mrb[2].mxu1 %vm132_vm1, %v211_v23  ;;  %v587_v23 = vld [vmem:[#allocation10 + $0x10] sm:$0xff] }
 0x157   :  { %922 = vmatprep.mubr.msk.f32.mxu1 %vm1245_vm0, %v1246_v1  ;;  %1002 = vmatpush3.bf16.msra.mxu1 %v1001_v53  ;;  %v1022_v25 = vpack.c.bf16 %v588_v24, %v587_v23 }
 0x158   :  { %1003 = vmatprep.subr.bf16.mxu1 %v1244_v0 }
 0x15b   :  { %1005 = vmatpush3.bf16.msra.mxu1 %v1004_v55 }
 0x15c   :  { %1018 = vmatprep.subr.bf16.mxu1 %v1244_v0 }
 0x229   :  { %v292_v31 = vpop.f32.mrb[2].mxu1 }
 0x22a   :  { %v293_v32 = vadd.f32 %v817_v30, %v292_v31  ;;  %v902_v33 = vpop.f32.mrb[3].mxu1  ;;  %v826_v31 = vld [vmem:[%s1571_s10] ss:$0 sm:$0xff] }
 0x22c   :  { %v297_v34 = vmin.f32 %v293_v32, 0.0  ;;  %vm296_vm3 = vcmp.gt.f32.partialorder %v293_v32, 0.0 }
 0x22e   :  { %v298_v35 = vmul.f32 1.442695, %v297_v34 }
 0x230   :  { %1061 = vpow2.f32 %v298_v35 }
 0x23a   :  { %v1062_v36 = vpop.eup %1061 }
 0x23b   :  { %v819_v37 = vadd.f32 -1.0, %v1062_v36 }
 0x23d   :  { %v301_v38 = vsel %vm296_vm3, %v293_v32, %v819_v37 }
 0x23e   :  { %912 = vmatmul.mubr.msk.f32.vlgmr.msra.gmra.mrb[0].mxu0 %vm132_vm1, %v301_v38 }
 0x23f   :  { %941 = vmatprep.mubr.msk.f32.mxu0 %vm1245_vm0, %v1246_v1  ;;  %1008 = vmatpush3.bf16.msra.mxu0 %v1007_v62 }
 0x240   :  { %1009 = vmatprep.subr.bf16.mxu0 %v1244_v0 }
 0x243   :  { %1011 = vmatpush3.bf16.msra.mxu0 %v1010_v3 }
 0x244   :  { %1012 = vmatprep.subr.bf16.mxu0 %v1244_v0 }
 0x247   :  { %1014 = vmatpush3.bf16.msra.mxu0 %v1013_v6 }
 0x248   :  { %1015 = vmatprep.subr.bf16.mxu0 %v1244_v0 }
 0x24b   :  { %1017 = vmatpush3.bf16.msra.mxu0 %v1016_v10 }
 0x24c   :  { %1030 = vmatprep.subr.bf16.mxu0 %v1244_v0 }
 0x311   :  { %v382_v40 = vpop.f32.mrb[0].mxu0 }
 0x312   :  { %v383_v41 = vadd.f32 %v820_v39, %v382_v40  ;;  %v913_v42 = vpop.f32.mrb[1].mxu0  ;;  %v679_v40 = vld [vmem:[%s1574_s13] sm:$0xff] }
 0x314   :  { %v387_v43 = vmin.f32 %v383_v41, 0.0  ;;  %vm386_vm4 = vcmp.gt.f32.partialorder %v383_v41, 0.0 }
 0x316   :  { %v388_v44 = vmul.f32 1.442695, %v387_v43  ;;  %v681_v43 = vld [vmem:[%s1574_s13 + $0x10] sm:$0xff] }
 0x318   :  { %1063 = vpow2.f32 %v388_v44  ;;  %v682_v44 = vld [vmem:[%s1574_s13 + $0x18] sm:$0xff] }
 0x322   :  { %v1064_v45 = vpop.eup %1063 }
 0x323   :  { %v822_v46 = vadd.f32 -1.0, %v1064_v45  ;;  %v1034_v45 = vpack.c.bf16 %v682_v44, %v681_v43 }
 0x325   :  { %v391_v47 = vsel %vm386_vm4, %v383_v41, %v822_v46  ;;  %v680_v41 = vld [vmem:[%s1574_s13 + $0x8] sm:$0xff]  ;;  %v683_v46 = vld [vmem:[%s1574_s13 + $0x20] sm:$0xff] }
 0x326   :  { %v392_v48 = vmul.f32 %v391_v47, %v391_v47  ;;  %v1031_v42 = vpack.c.bf16 %v680_v41, %v679_v40 }
 0x328   :  { %v393_v49 = vsel %vm132_vm1, %v392_v48, 0.0 }
 0x329   :  { %394 = vadd.xlane.f32.xlu0 %v393_v49  ;;  %v685_v49 = vld [vmem:[%s1574_s13 + $0x30] sm:$0xff] }
 0x32a   :  { %v1040_v51 = vpack.c.bf16 %v686_v50, %v685_v49 }
 0x3b6   :  { %v395_v56 = vpop.xlane.xlu0 %394 }
 0x3b7   :  { %v396_v57 = vmax.f32 %v395_v56, 1e-10 }
 0x3b9   :  { %1065 = vrsqrt.f32 %v396_v57 }
 0x3c3   :  { %v1066_v58 = vpop.eup %1065 }
 0x3c4   :  { %v398_v59 = vmul.f32 %v1066_v58, %v391_v47  ;;  %v684_v47 = vld [vmem:[%s1574_s13 + $0x28] sm:$0xff] }
 0x3c5   :  { %v1037_v48 = vpack.c.bf16 %v684_v47, %v683_v46 }
 0x3c6   :  { %923 = vmatmul.mubr.msk.f32.vlgmr.msra.gmra.mrb[4].mxu1 %vm132_vm1, %v398_v59  ;;  %399 = vst.msk [vmem:[#allocation11] sm:$0xff] %vm132_vm1, %v398_v59 }
 0x3c7   :  { %960 = vmatprep.mubr.msk.f32.mxu1 %vm1245_vm0, %v1246_v1  ;;  %1020 = vmatpush3.bf16.msra.mxu1 %v1019_v22 }
 0x3c8   :  { %1021 = vmatprep.subr.bf16.mxu1 %v1244_v0 }
 0x3cb   :  { %1023 = vmatpush3.bf16.msra.mxu1 %v1022_v25 }
 0x3cc   :  { %1024 = vmatprep.subr.bf16.mxu1 %v1244_v0 }
 0x3cf   :  { %1026 = vmatpush3.bf16.msra.mxu1 %v1025_v28 }
 0x3d0   :  { %1027 = vmatprep.subr.bf16.mxu1 %v1244_v0 }
 0x499   :  { %v480_v12 = vpop.f32.mrb[4].mxu1 }
 0x49a   :  { %v481_v13 = vadd.f32 %v823_v11, %v480_v12  ;;  %v924_v14 = vpop.f32.mrb[5].mxu1 }
 0x49c   :  { %v485_v15 = vmin.f32 %v481_v13, 0.0  ;;  %vm484_vm6 = vcmp.gt.f32.partialorder %v481_v13, 0.0 }
 0x49e   :  { %v486_v16 = vmul.f32 1.442695, %v485_v15 }
 0x4a0   :  { %1067 = vpow2.f32 %v486_v16 }
 0x4aa   :  { %v1068_v17 = vpop.eup %1067 }
 0x4ab   :  { %v825_v18 = vadd.f32 -1.0, %v1068_v17 }
 0x4ad   :  { %v489_v19 = vsel %vm484_vm6, %v481_v13, %v825_v18 }
 0x4ae   :  { %942 = vmatmul.mubr.msk.f32.vlgmr.msra.gmra.mrb[2].mxu0 %vm505_vm5, %v489_v19 }
 0x4af   :  { %979 = vmatprep.mubr.msk.f32.mxu0 %vm1245_vm0, %v1246_v1  ;;  %v592_v1 = vld [vmem:[#allocation10 + $0x38] sm:$0xff]  ;;  %1032 = vmatpush3.bf16.msra.mxu0 %v1031_v42 }
 0x4b0   :  { %v1028_v30 = vpack.c.bf16 %v592_v1, %v591_v29  ;;  %1033 = vmatprep.subr.bf16.mxu0 %v1244_v0 }
 0x4b2   :  { %1029 = vmatpush3.bf16.msra.mxu1 %v1028_v30 }
 0x4b3   :  { %1035 = vmatpush3.bf16.msra.mxu0 %v1034_v45 }
 0x4b4   :  { %1036 = vmatprep.subr.bf16.mxu0 %v1244_v0 }
 0x4b7   :  { %1038 = vmatpush3.bf16.msra.mxu0 %v1037_v48 }
 0x4b8   :  { %1039 = vmatprep.subr.bf16.mxu0 %v1244_v0 }
 0x4bb   :  { %1041 = vmatpush3.bf16.msra.mxu0 %v1040_v51 }
 0x581   :  { %v575_v32 = vpop.f32.mrb[2].mxu0 }
 0x582   :  { %v576_v33 = vadd.f32 %v826_v31, %v575_v32  ;;  %v943_v34 = vpop.f32.mrb[3].mxu0 }
 0x584   :  { %v580_v35 = vmin.f32 %v576_v33, 0.0  ;;  %vm579_vm7 = vcmp.gt.f32.partialorder %v576_v33, 0.0 }
 0x586   :  { %v581_v36 = vmul.f32 1.442695, %v580_v35 }
 0x588   :  { %1069 = vpow2.f32 %v581_v36 }
 0x592   :  { %v1070_v37 = vpop.eup %1069 }
 0x593   :  { %v828_v38 = vadd.f32 -1.0, %v1070_v37 }
 0x595   :  { %v584_v39 = vsel %vm579_vm7, %v576_v33, %v828_v38 }
 0x596   :  { %961 = vmatmul.mubr.msk.f32.vlgmr.msra.gmra.mrb[6].mxu1 %vm505_vm5, %v584_v39 }
 0x669   :  { %v669_v53 = vpop.f32.mrb[6].mxu1 }
 0x66a   :  { %v670_v54 = vadd.f32 %v829_v52, %v669_v53  ;;  %v962_v55 = vpop.f32.mrb[7].mxu1 }
 0x66c   :  { %v674_v56 = vmin.f32 %v670_v54, 0.0  ;;  %vm673_vm8 = vcmp.gt.f32.partialorder %v670_v54, 0.0 }
 0x66e   :  { %v675_v57 = vmul.f32 1.442695, %v674_v56 }
 0x670   :  { %1071 = vpow2.f32 %v675_v57 }
 0x67a   :  { %v1072_v0 = vpop.eup %1071 }
 0x67b   :  { %v831_v58 = vadd.f32 -1.0, %v1072_v0 }
 0x67d   :  { %v678_v59 = vsel %vm673_vm8, %v670_v54, %v831_v58 }
 0x67e   :  { %980 = vmatmul.mubr.msk.f32.vlgmr.msra.gmra.mrb[4].mxu0 %vm505_vm5, %v678_v59 }
 0x751   :  { %v763_v62 = vpop.f32.mrb[4].mxu0 }
 0x752   :  { %v764_v63 = vadd.f32 %v832_v61, %v763_v62  ;;  %v981_v2 = vpop.f32.mrb[5].mxu0 }
 0x754   :  { %772 = vrot.lane.b32.xlu1 %v764_v63, %s1248_s12  ;;  %769 = vrot.lane.b32.xlu0 %v764_v63, %s1249_s17 }
 0x7c6   :  { %v773_v3 = vpop.permute.xlu1 %772  ;;  %v770_v4 = vpop.permute.xlu0 %769 }
 0x7c7   :  { %v775_v5 = vsel %vm767_vm9, %v770_v4, %v773_v3 }
 0x7c8   :  { %778 = vperm.xlu1 %1057, %v775_v5  }
 0x7c9   :  { %1194 = shalt.err (!%p1191_p2)
}
 0x7ca   :  { %s1195_s24 = scalar_lea.hbm %s1576_s15, 128 }
 0x7cb   :  { %p1196_p3 = scmp.ne.s32.totalorder %s1576_s15, %s1195_s24  ;;  %p1199_p4 = scmp.lt.u32.totalorder %s1195_s24, %s1576_s15 }
 0x7cd   :  { %p1201_p5 = pnand %p1199_p4, %p1196_p3 }
 0x7cf   :  { %1204 = shalt.err (!%p1201_p5)
}
 0x7d0   :  { %792 = dma.vmem_to_hbm [thread:$0]  %s790_s26, 128, %s1576_s15, [#allocation4]   ;;  %vm781_vm10 = vcmask 64512  }
 0x7d1   :  { %s1251_s10 = smov [#allocation12]  }
 0x7d2   :  { %s799_s7 = sshll.u32 %s1251_s10, 4  ;;  %s800_s7 = int_to_ptr.vmem [resolvable:$true] %s799_s7 }
 0x7d3   :  { %s1205_s21 = scalar_lea.vmem %s800_s7, 128  ;;  %p1210_p7 = scmp.lt.s32.totalorder %s800_s7, %s800_s7 }
 0x7d4   :  { %p1206_p6 = scmp.ne.s32.totalorder %s800_s7, %s1205_s21  ;;  %p1211_p8 = scmp.lt.s32.totalorder %s1205_s21, %s1205_s21 }
 0x7d6   :  { %p1212_p9 = por %p1211_p8, %p1210_p7 }
 0x7d8   :  { %p1213_p10 = pnand %p1212_p9, %p1206_p6 }
 0x847   :  { %v779_v8 = vpop.permute.xlu1 %778 }
 0x848   :  { %782 = vst.msk [vmem:[#allocation12] sm:$0xff] %vm781_vm10, %v779_v8 }
 0x849   :  { %1216 = shalt.err (!%p1213_p10)
}
 0x84a   :  { %s1583_s30 = sld [smem:[#allocation20_spill]] }
 0x850   :  { %s1217_s22 = scalar_lea.hbm %s1583_s30, 128 }
 0x851   :  { %p1218_p11 = scmp.ne.s32.totalorder %s1583_s30, %s1217_s22  ;;  %p1221_p12 = scmp.lt.u32.totalorder %s1217_s22, %s1583_s30 }
 0x853   :  { %p1223_p13 = pnand %p1221_p12, %p1218_p11 }
 0x855   :  { %1226 = shalt.err (!%p1223_p13)
}
 0x856   :  { %802 = dma.vmem_to_hbm [thread:$0]  %s800_s7, 128, %s1583_s30, [#allocation13]  }
 0x857   :  { %1233 = dma.done.wait [#allocation4], 128  }
 0x858   :  { %1234 = vsyncadd [#allocation4], 4294967168 }
 0x859   :  { %1235 = dma.done.wait [#allocation13], 128  }
 0x85a   :  { %1236 = vsyncadd [#allocation13], 4294967168 }
 0x85b   :  { %809 = vsyncpa [#allocation3], 1 }
 0x85c   :  { %810 = vsyncpa [#allocation6], 1 }
 0x85d   :  { %811 = vsyncpa [#allocation9], 1 }
 0x85e   :  { %812 = vsyncpa [#allocation4], 1 }
 0x85f   :  { %813 = vsyncpa [#allocation13], 1 }

</bundles_post_ra>
